<compile_context>
chip_gen: v6e
topology: v6e:2x2x1
jax: 0.10.0
libtpu: 0.0.40
codegen_flags: <defaults>
</compile_context>

<pallas_src>
import functools

import jax
import jax.numpy as jnp
from jax.experimental import pallas as pl
from jax.experimental.pallas import tpu as pltpu


# ----------------------------------------------------------------------------
# Kernel
# ----------------------------------------------------------------------------
def _kd_kernel(s_ref, t_ref, out_ref, m_s, d_s, m_t, d_t, acc, *, T):
    """Online (streaming over class blocks) KD-KL accumulation.

    Per row r (logits already scaled by 1/T):
        KL_r = sum_c p_t[c] * (log p_t[c] - log p_s[c])
             = acc_r / d_t_r + (m_s_r + log d_s_r) - (m_t_r + log d_t_r)
    with m_* the running maxima, d_* the running softmax denominators and
    acc_r the running sum of exp(t - m_t) * (t - s).
    """
    c_idx = pl.program_id(1)

    @pl.when(c_idx == 0)
    def _init():
        m_s[...] = jnp.full(m_s.shape, -jnp.inf, dtype=jnp.float32)
        m_t[...] = jnp.full(m_t.shape, -jnp.inf, dtype=jnp.float32)
        d_s[...] = jnp.zeros(d_s.shape, dtype=jnp.float32)
        d_t[...] = jnp.zeros(d_t.shape, dtype=jnp.float32)
        acc[...] = jnp.zeros(acc.shape, dtype=jnp.float32)

    inv_T = jnp.float32(1.0 / T)
    s = s_ref[...].astype(jnp.float32) * inv_T
    t = t_ref[...].astype(jnp.float32) * inv_T
    t_minus_s = t - s

    # -- student: online logsumexp (only max + denominator needed) -----------
    m_s_new = jnp.maximum(m_s[...], jnp.max(s, axis=-1, keepdims=True))
    d_s[...] = d_s[...] * jnp.exp(m_s[...] - m_s_new) + jnp.sum(
        jnp.exp(s - m_s_new), axis=-1, keepdims=True)          # full-width exp #1
    m_s[...] = m_s_new

    # -- teacher: online softmax denom + weighted (t - s) accumulator --------
    m_t_new = jnp.maximum(m_t[...], jnp.max(t, axis=-1, keepdims=True))
    rescale = jnp.exp(m_t[...] - m_t_new)                       # (rows, 1), cheap
    e_t = jnp.exp(t - m_t_new)                                  # full-width exp #2
    d_t[...] = d_t[...] * rescale + jnp.sum(e_t, axis=-1, keepdims=True)
    acc[...] = acc[...] * rescale + jnp.sum(e_t * t_minus_s, axis=-1, keepdims=True)
    m_t[...] = m_t_new

    @pl.when(c_idx == pl.num_programs(1) - 1)
    def _finalize():
        kd = (acc[...] / d_t[...]
              + (m_s[...] + jnp.log(d_s[...]))
              - (m_t[...] + jnp.log(d_t[...])))
        out_ref[...] = kd


# ----------------------------------------------------------------------------
# Tiling / wrapper
# ----------------------------------------------------------------------------
_FALLBACK_VMEM_BYTES = 64 * 1024 * 1024   # v7x per-TC VMEM: the most constrained gen


def _vmem_capacity_bytes():
    try:
        cap = getattr(pltpu.get_tpu_info(), "vmem_capacity_bytes", None)
        if cap:
            return int(cap)
    except Exception:
        pass
    return _FALLBACK_VMEM_BYTES


def _choose_tiles(N, C, itemsize, buf_budget_bytes):
    """Pick (block_rows, block_c) so 2 inputs x 2 pipeline buffers fit budget."""
    bytes_per_elem = 2 * 2 * itemsize   # two logit streams, double-buffered
    min_rows = 16                       # multiple of 8 (f32) and 16 (bf16 sublanes)
    target_rows = 256                   # big tiles amortize ~0.35us/grid-step

    # Tile the class dim (online softmax) only when full-C blocks would force
    # tiny row tiles.  block_c stays a power-of-two fraction of C that is a
    # multiple of 128 and divides C, so C-blocks never contain garbage lanes.
    block_c = C
    if C % 128 == 0:
        while (bytes_per_elem * target_rows * block_c > buf_budget_bytes
               and block_c % 256 == 0 and block_c > 512):
            block_c //= 2

    block_rows = buf_budget_bytes // (bytes_per_elem * block_c)
    block_rows = max(min_rows, (block_rows // min_rows) * min_rows)
    block_rows = min(block_rows, 1024)
    if block_rows >= N:
        return N, block_c               # a full-dim block is always legal
    return max(8, (block_rows // 8) * 8), block_c


def kd_per_row(output_logits, teacher_logits, T=1.0, block_rows=None, block_c=None):
    """Per-row KD loss sum_c p_t * (log p_t - log p_s), shape (N,), float32."""
    N, C = output_logits.shape
    assert teacher_logits.shape == (N, C)

    vmem_cap = _vmem_capacity_bytes()
    vmem_limit = int(vmem_cap * 0.75)          # explicit limit, leave headroom
    auto_rows, auto_c = _choose_tiles(
        N, C, jnp.dtype(output_logits.dtype).itemsize, int(vmem_limit * 0.75))
    block_rows = auto_rows if block_rows is None else min(block_rows, N)
    block_c = auto_c if block_c is None else block_c
    assert C % block_c == 0, "class-dim tile must divide C"

    grid = (pl.cdiv(N, block_rows), C // block_c)

    out = pl.pallas_call(
        functools.partial(_kd_kernel, T=T),
        out_shape=jax.ShapeDtypeStruct((N, 1), jnp.float32),
        grid_spec=pltpu.PrefetchScalarGridSpec(
            num_scalar_prefetch=0,
            grid=grid,
            in_specs=[
                pl.BlockSpec((block_rows, block_c), lambda i, c: (i, c)),
                pl.BlockSpec((block_rows, block_c), lambda i, c: (i, c)),
            ],
            # Output block is revisited across the class axis; written once at
            # the last class block per row block.
            out_specs=pl.BlockSpec((block_rows, 1), lambda i, c: (i, 0)),
            scratch_shapes=[pltpu.VMEM((block_rows, 1), jnp.float32)] * 5,
        ),
        compiler_params=pltpu.CompilerParams(
            dimension_semantics=("parallel", "arbitrary"),
            vmem_limit_bytes=vmem_limit,
        ),
    )(output_logits, teacher_logits)
    return out[:, 0]


def kd_loss(output_logits, teacher_logits, label_mask=None, alpha_kd=1.0, T=1.0,
            block_rows=None, block_c=None):
    """Reproduces KDLoss.forward semantics.

    - label_mask is None: per-row vector of shape (N,)
    - label_mask given (bool, flattened to (N,)): scalar
      sum(masked per-row loss) / sum(mask)
    Both scaled by alpha_kd * T * T.
    """
    assert 0 <= alpha_kd <= 5
    assert T > 0
    kd = kd_per_row(output_logits, teacher_logits, T=T,
                    block_rows=block_rows, block_c=block_c)
    if label_mask is not None:
        mask = label_mask.reshape(-1)
        masked = jnp.where(mask, kd, jnp.float32(0.0))
        # NOTE: like the PyTorch reference, an all-False mask divides by zero.
        kd = masked.sum() / mask.sum().astype(jnp.float32)
    return kd * jnp.float32(alpha_kd * T * T)


# ----------------------------------------------------------------------------
# Pure-JAX reference
# ----------------------------------------------------------------------------
def _reference(output_logits, teacher_logits, label_mask, alpha_kd, T):
    s = output_logits.astype(jnp.float32) / T
    t = teacher_logits.astype(jnp.float32) / T
    log_p_s = jax.nn.log_softmax(s, axis=1)
    log_p_t = jax.nn.log_softmax(t, axis=1)
    p_t = jnp.exp(log_p_t)
    kd = jnp.sum(p_t * (log_p_t - log_p_s), axis=1)
    if label_mask is not None:
        mask = label_mask.reshape(-1)
        kd = jnp.where(mask, kd, 0.0).sum() / mask.sum().astype(jnp.float32)
    return kd * alpha_kd * T * T


if __name__ == "__main__":
    key = jax.random.PRNGKey(0)
    k1, k2, k3, k4, k5 = jax.random.split(key, 5)

    alpha_kd, T = 1.0, 2.0

    # --- Case 1: small f32 logits, single block, masked + unmasked paths ----
    N1, C1 = 8, 32
    student = jax.random.normal(k1, (N1, C1), dtype=jnp.float32)
    teacher = jax.random.normal(k2, (N1, C1), dtype=jnp.float32)
    label_mask = jax.random.bernoulli(k3, p=0.7, shape=(N1,))
    label_mask = label_mask.at[0].set(True)   # keep mask.sum() > 0

    out_vec = jax.block_until_ready(
        kd_loss(student, teacher, None, alpha_kd=alpha_kd, T=T))
    out_scalar = jax.block_until_ready(
        kd_loss(student, teacher, label_mask, alpha_kd=alpha_kd, T=T))

    ref_vec = _reference(student, teacher, None, alpha_kd, T)
    ref_scalar = _reference(student, teacher, label_mask, alpha_kd, T)

    assert out_vec.shape == (N1,)
    assert out_scalar.shape == ()
    assert jnp.allclose(out_vec, ref_vec, atol=1e-5, rtol=1e-5)
    assert jnp.allclose(out_scalar, ref_scalar, atol=1e-5, rtol=1e-5)

    # --- Case 2: bf16 logits, forced row + class tiling ---------------------
    # (exercises the online multi-C-block accumulation and multi-row-block grid)
    N2, C2 = 64, 256
    student2 = jax.random.normal(k4, (N2, C2), dtype=jnp.float32).astype(jnp.bfloat16)
    teacher2 = jax.random.normal(k5, (N2, C2), dtype=jnp.float32).astype(jnp.bfloat16)

    out2 = jax.block_until_ready(
        kd_loss(student2, teacher2, None, alpha_kd=alpha_kd, T=T,
                block_rows=16, block_c=128))
    ref2 = _reference(student2, teacher2, None, alpha_kd, T)
    assert out2.shape == (N2,)
    assert jnp.allclose(out2, ref2, atol=1e-4, rtol=1e-4)

    print("KERNEL_OK")
</pallas_src>

<mosaic_0001>
module attributes {stable_mosaic.version = 11 : i64} {
  func.func @_kd_kernel(%arg0: i32, %arg1: i32, %arg2: memref<8x32xf32, #tpu.memory_space<vmem>>, %arg3: memref<8x32xf32, #tpu.memory_space<vmem>>, %arg4: memref<8x1xf32, #tpu.memory_space<vmem>>, %arg5: memref<8x1xf32, #tpu.memory_space<vmem>>, %arg6: memref<8x1xf32, #tpu.memory_space<vmem>>, %arg7: memref<8x1xf32, #tpu.memory_space<vmem>>, %arg8: memref<8x1xf32, #tpu.memory_space<vmem>>, %arg9: memref<8x1xf32, #tpu.memory_space<vmem>>) attributes {dimension_semantics = [#tpu.dimension_semantics<parallel>, #tpu.dimension_semantics<arbitrary>], iteration_bounds = array<i64: 1, 1>, scalar_prefetch = 0 : i64, scratch_operands = 5 : i64, tpu.core_type = #tpu.core_type<tc>, window_params = [{transform_indices = @transform_0, window_bounds = array<i64: 8, 32>}, {transform_indices = @transform_1, window_bounds = array<i64: 8, 32>}, {transform_indices = @transform_2, window_bounds = array<i64: 8, 1>}]} {
    %c0_i32 = arith.constant 0 : i32
    %0 = arith.cmpi eq, %arg1, %c0_i32 : i32
    %1 = arith.extui %0 : i1 to i32
    %c0_i32_0 = arith.constant 0 : i32
    %2 = arith.cmpi ne, %1, %c0_i32_0 : i32
    scf.if %2 {
      %cst_36 = arith.constant 0xFF800000 : f32
      %54 = vector.broadcast %cst_36 : f32 to vector<8x1xf32>
      %c0_37 = arith.constant 0 : index
      %c0_38 = arith.constant 0 : index
      %55 = vector.load %arg5[%c0_37, %c0_38] : memref<8x1xf32, #tpu.memory_space<vmem>>, vector<8x1xf32>
      tpu.vector_store %arg5[%c0_37, %c0_38], %54 {strides = array<i32>} : memref<8x1xf32, #tpu.memory_space<vmem>>, vector<8x1xf32>,
      %cst_39 = arith.constant 0xFF800000 : f32
      %56 = vector.broadcast %cst_39 : f32 to vector<8x1xf32>
      %c0_40 = arith.constant 0 : index
      %c0_41 = arith.constant 0 : index
      %57 = vector.load %arg7[%c0_40, %c0_41] : memref<8x1xf32, #tpu.memory_space<vmem>>, vector<8x1xf32>
      tpu.vector_store %arg7[%c0_40, %c0_41], %56 {strides = array<i32>} : memref<8x1xf32, #tpu.memory_space<vmem>>, vector<8x1xf32>,
      %cst_42 = arith.constant 0.000000e+00 : f32
      %58 = vector.broadcast %cst_42 : f32 to vector<8x1xf32>
      %c0_43 = arith.constant 0 : index
      %c0_44 = arith.constant 0 : index
      %59 = vector.load %arg6[%c0_43, %c0_44] : memref<8x1xf32, #tpu.memory_space<vmem>>, vector<8x1xf32>
      tpu.vector_store %arg6[%c0_43, %c0_44], %58 {strides = array<i32>} : memref<8x1xf32, #tpu.memory_space<vmem>>, vector<8x1xf32>,
      %cst_45 = arith.constant 0.000000e+00 : f32
      %60 = vector.broadcast %cst_45 : f32 to vector<8x1xf32>
      %c0_46 = arith.constant 0 : index
      %c0_47 = arith.constant 0 : index
      %61 = vector.load %arg8[%c0_46, %c0_47] : memref<8x1xf32, #tpu.memory_space<vmem>>, vector<8x1xf32>
      tpu.vector_store %arg8[%c0_46, %c0_47], %60 {strides = array<i32>} : memref<8x1xf32, #tpu.memory_space<vmem>>, vector<8x1xf32>,
      %cst_48 = arith.constant 0.000000e+00 : f32
      %62 = vector.broadcast %cst_48 : f32 to vector<8x1xf32>
      %c0_49 = arith.constant 0 : index
      %c0_50 = arith.constant 0 : index
      %63 = vector.load %arg9[%c0_49, %c0_50] : memref<8x1xf32, #tpu.memory_space<vmem>>, vector<8x1xf32>
      tpu.vector_store %arg9[%c0_49, %c0_50], %62 {strides = array<i32>} : memref<8x1xf32, #tpu.memory_space<vmem>>, vector<8x1xf32>,
    } else {
    }
    %c0 = arith.constant 0 : index
    %c0_1 = arith.constant 0 : index
    %3 = vector.load %arg2[%c0, %c0_1] : memref<8x32xf32, #tpu.memory_space<vmem>>, vector<8x32xf32>
    %cst = arith.constant 5.000000e-01 : f32
    %4 = vector.broadcast %cst : f32 to vector<8x32xf32>
    %5 = arith.mulf %3, %4 : vector<8x32xf32>
    %c0_2 = arith.constant 0 : index
    %c0_3 = arith.constant 0 : index
    %6 = vector.load %arg3[%c0_2, %c0_3] : memref<8x32xf32, #tpu.memory_space<vmem>>, vector<8x32xf32>
    %cst_4 = arith.constant 5.000000e-01 : f32
    %7 = vector.broadcast %cst_4 : f32 to vector<8x32xf32>
    %8 = arith.mulf %6, %7 : vector<8x32xf32>
    %9 = arith.subf %8, %5 : vector<8x32xf32>
    %c0_5 = arith.constant 0 : index
    %c0_6 = arith.constant 0 : index
    %10 = vector.load %arg5[%c0_5, %c0_6] : memref<8x1xf32, #tpu.memory_space<vmem>>, vector<8x1xf32>
    %cst_7 = arith.constant dense<0xFF800000> : vector<8xf32>
    %11 = vector.multi_reduction <maximumf>, %5, %cst_7 [1] : vector<8x32xf32> to vector<8xf32>
    %12 = vector.shape_cast %11 : vector<8xf32> to vector<8x1xf32>
    %13 = arith.maximumf %10, %12 : vector<8x1xf32>
    %c0_8 = arith.constant 0 : index
    %c0_9 = arith.constant 0 : index
    %14 = vector.load %arg6[%c0_8, %c0_9] : memref<8x1xf32, #tpu.memory_space<vmem>>, vector<8x1xf32>
    %c0_10 = arith.constant 0 : index
    %c0_11 = arith.constant 0 : index
    %15 = vector.load %arg5[%c0_10, %c0_11] : memref<8x1xf32, #tpu.memory_space<vmem>>, vector<8x1xf32>
    %16 = arith.subf %15, %13 : vector<8x1xf32>
    %17 = math.exp %16 : vector<8x1xf32>
    %18 = arith.mulf %14, %17 : vector<8x1xf32>
    %19 = vector.broadcast %13 : vector<8x1xf32> to vector<8x32xf32>
    %20 = arith.subf %5, %19 : vector<8x32xf32>
    %21 = math.exp %20 : vector<8x32xf32>
    %cst_12 = arith.constant dense<0.000000e+00> : vector<8xf32>
    %22 = vector.multi_reduction <add>, %21, %cst_12 [1] : vector<8x32xf32> to vector<8xf32>
    %23 = vector.shape_cast %22 : vector<8xf32> to vector<8x1xf32>
    %24 = arith.addf %18, %23 : vector<8x1xf32>
    %c0_13 = arith.constant 0 : index
    %c0_14 = arith.constant 0 : index
    %25 = vector.load %arg6[%c0_13, %c0_14] : memref<8x1xf32, #tpu.memory_space<vmem>>, vector<8x1xf32>
    tpu.vector_store %arg6[%c0_13, %c0_14], %24 {strides = array<i32>} : memref<8x1xf32, #tpu.memory_space<vmem>>, vector<8x1xf32>,
    %c0_15 = arith.constant 0 : index
    %c0_16 = arith.constant 0 : index
    %26 = vector.load %arg5[%c0_15, %c0_16] : memref<8x1xf32, #tpu.memory_space<vmem>>, vector<8x1xf32>
    tpu.vector_store %arg5[%c0_15, %c0_16], %13 {strides = array<i32>} : memref<8x1xf32, #tpu.memory_space<vmem>>, vector<8x1xf32>,
    %c0_17 = arith.constant 0 : index
    %c0_18 = arith.constant 0 : index
    %27 = vector.load %arg7[%c0_17, %c0_18] : memref<8x1xf32, #tpu.memory_space<vmem>>, vector<8x1xf32>
    %cst_19 = arith.constant dense<0xFF800000> : vector<8xf32>
    %28 = vector.multi_reduction <maximumf>, %8, %cst_19 [1] : vector<8x32xf32> to vector<8xf32>
    %29 = vector.shape_cast %28 : vector<8xf32> to vector<8x1xf32>
    %30 = arith.maximumf %27, %29 : vector<8x1xf32>
    %c0_20 = arith.constant 0 : index
    %c0_21 = arith.constant 0 : index
    %31 = vector.load %arg7[%c0_20, %c0_21] : memref<8x1xf32, #tpu.memory_space<vmem>>, vector<8x1xf32>
    %32 = arith.subf %31, %30 : vector<8x1xf32>
    %33 = math.exp %32 : vector<8x1xf32>
    %34 = vector.broadcast %30 : vector<8x1xf32> to vector<8x32xf32>
    %35 = arith.subf %8, %34 : vector<8x32xf32>
    %36 = math.exp %35 : vector<8x32xf32>
    %c0_22 = arith.constant 0 : index
    %c0_23 = arith.constant 0 : index
    %37 = vector.load %arg8[%c0_22, %c0_23] : memref<8x1xf32, #tpu.memory_space<vmem>>, vector<8x1xf32>
    %38 = arith.mulf %37, %33 : vector<8x1xf32>
    %cst_24 = arith.constant dense<0.000000e+00> : vector<8xf32>
    %39 = vector.multi_reduction <add>, %36, %cst_24 [1] : vector<8x32xf32> to vector<8xf32>
    %40 = vector.shape_cast %39 : vector<8xf32> to vector<8x1xf32>
    %41 = arith.addf %38, %40 : vector<8x1xf32>
    %c0_25 = arith.constant 0 : index
    %c0_26 = arith.constant 0 : index
    %42 = vector.load %arg8[%c0_25, %c0_26] : memref<8x1xf32, #tpu.memory_space<vmem>>, vector<8x1xf32>
    tpu.vector_store %arg8[%c0_25, %c0_26], %41 {strides = array<i32>} : memref<8x1xf32, #tpu.memory_space<vmem>>, vector<8x1xf32>,
    %c0_27 = arith.constant 0 : index
    %c0_28 = arith.constant 0 : index
    %43 = vector.load %arg9[%c0_27, %c0_28] : memref<8x1xf32, #tpu.memory_space<vmem>>, vector<8x1xf32>
    %44 = arith.mulf %43, %33 : vector<8x1xf32>
    %45 = arith.mulf %36, %9 : vector<8x32xf32>
    %cst_29 = arith.constant dense<0.000000e+00> : vector<8xf32>
    %46 = vector.multi_reduction <add>, %45, %cst_29 [1] : vector<8x32xf32> to vector<8xf32>
    %47 = vector.shape_cast %46 : vector<8xf32> to vector<8x1xf32>
    %48 = arith.addf %44, %47 : vector<8x1xf32>
    %c0_30 = arith.constant 0 : index
    %c0_31 = arith.constant 0 : index
    %49 = vector.load %arg9[%c0_30, %c0_31] : memref<8x1xf32, #tpu.memory_space<vmem>>, vector<8x1xf32>
    tpu.vector_store %arg9[%c0_30, %c0_31], %48 {strides = array<i32>} : memref<8x1xf32, #tpu.memory_space<vmem>>, vector<8x1xf32>,
    %c0_32 = arith.constant 0 : index
    %c0_33 = arith.constant 0 : index
    %50 = vector.load %arg7[%c0_32, %c0_33] : memref<8x1xf32, #tpu.memory_space<vmem>>, vector<8x1xf32>
    tpu.vector_store %arg7[%c0_32, %c0_33], %30 {strides = array<i32>} : memref<8x1xf32, #tpu.memory_space<vmem>>, vector<8x1xf32>,
    %c0_i32_34 = arith.constant 0 : i32
    %51 = arith.cmpi eq, %arg1, %c0_i32_34 : i32
    %52 = arith.extui %51 : i1 to i32
    %c0_i32_35 = arith.constant 0 : i32
    %53 = arith.cmpi ne, %52, %c0_i32_35 : i32
    scf.if %53 {
      %c0_36 = arith.constant 0 : index
      %c0_37 = arith.constant 0 : index
      %54 = vector.load %arg9[%c0_36, %c0_37] : memref<8x1xf32, #tpu.memory_space<vmem>>, vector<8x1xf32>
      %c0_38 = arith.constant 0 : index
      %c0_39 = arith.constant 0 : index
      %55 = vector.load %arg8[%c0_38, %c0_39] : memref<8x1xf32, #tpu.memory_space<vmem>>, vector<8x1xf32>
      %56 = arith.divf %54, %55 : vector<8x1xf32>
      %c0_40 = arith.constant 0 : index
      %c0_41 = arith.constant 0 : index
      %57 = vector.load %arg5[%c0_40, %c0_41] : memref<8x1xf32, #tpu.memory_space<vmem>>, vector<8x1xf32>
      %c0_42 = arith.constant 0 : index
      %c0_43 = arith.constant 0 : index
      %58 = vector.load %arg6[%c0_42, %c0_43] : memref<8x1xf32, #tpu.memory_space<vmem>>, vector<8x1xf32>
      %59 = math.log %58 : vector<8x1xf32>
      %60 = arith.addf %57, %59 : vector<8x1xf32>
      %61 = arith.addf %56, %60 : vector<8x1xf32>
      %c0_44 = arith.constant 0 : index
      %c0_45 = arith.constant 0 : index
      %62 = vector.load %arg7[%c0_44, %c0_45] : memref<8x1xf32, #tpu.memory_space<vmem>>, vector<8x1xf32>
      %c0_46 = arith.constant 0 : index
      %c0_47 = arith.constant 0 : index
      %63 = vector.load %arg8[%c0_46, %c0_47] : memref<8x1xf32, #tpu.memory_space<vmem>>, vector<8x1xf32>
      %64 = math.log %63 : vector<8x1xf32>
      %65 = arith.addf %62, %64 : vector<8x1xf32>
      %66 = arith.subf %61, %65 : vector<8x1xf32>
      %c0_48 = arith.constant 0 : index
      %c0_49 = arith.constant 0 : index
      %67 = vector.load %arg4[%c0_48, %c0_49] : memref<8x1xf32, #tpu.memory_space<vmem>>, vector<8x1xf32>
      tpu.vector_store %arg4[%c0_48, %c0_49], %66 {strides = array<i32>} : memref<8x1xf32, #tpu.memory_space<vmem>>, vector<8x1xf32>,
    } else {
    }
    return
  }
  func.func @transform_0(%arg0: i32, %arg1: i32) -> (i32, i32) {
    %c0_i32 = arith.constant 0 : i32
    return %arg0, %arg1 : i32, i32
  }
  func.func @transform_1(%arg0: i32, %arg1: i32) -> (i32, i32) {
    %c0_i32 = arith.constant 0 : i32
    return %arg0, %arg1 : i32, i32
  }
  func.func @transform_2(%arg0: i32, %arg1: i32) -> (i32, i32) {
    %c0_i32 = arith.constant 0 : i32
    %c0_i32_0 = arith.constant 0 : i32
    return %arg0, %c0_i32 : i32, i32
  }
}

</mosaic_0001>

<bundles_post_ra>
// kernel: tpu_custom_call.1
= control target key start
LH: loop header
LB: loop body
LE: loop exit
PB: predicated region body
PF: predicated region fallthrough
CT: control target
= control target key end

     0   :  { %7 = vsyncpa [#allocation8], 0  ;;  %s243_s0 = inlined_call_operand.hbm [shape: f32[8,32], index: 0, kind: input, shape index: {}]   ;;  %s244_s1 = inlined_call_operand.hbm [shape: f32[8,32], index: 1, kind: input, shape index: {}]   ;;  %s245_s2 = inlined_call_operand.vmem [shape: f32[8,1], index: 2, kind: output, shape index: {}]  }
   0x1   :  { %8 = vsyncpa [#allocation10], 0  ;;  %s198_s9 = smov [#allocation7]   ;;  %s199_s11 = smov [#allocation9]  }
   0x2   :  { %s15_s10 = sshll.u32 %s198_s9, 4  ;;  %s25_s12 = sshll.u32 %s199_s11, 4  ;;  %s16_s10 = int_to_ptr.vmem [resolvable:$true] %s15_s10  ;;  %s26_s12 = int_to_ptr.vmem [resolvable:$true] %s25_s12 }
   0x3   :  { %s162_s13 = scalar_lea.vmem %s16_s10, 128  ;;  %p167_p1 = scmp.lt.s32.totalorder %s16_s10, %s16_s10 }
   0x4   :  { %p163_p0 = scmp.ne.s32.totalorder %s16_s10, %s162_s13  ;;  %p168_p2 = scmp.lt.s32.totalorder %s162_s13, %s162_s13 }
   0x6   :  { %p169_p3 = por %p168_p2, %p167_p1 }
   0x8   :  { %p170_p4 = pnand %p169_p3, %p163_p0 }
   0xa   :  { %173 = shalt.err (!%p170_p4)
}
   0xb   :  { %18 = dma.hbm_to_vmem [thread:$0]  %s243_s0, 128, %s16_s10, [#allocation8]  }
   0xc   :  { %s182_s16 = scalar_lea.vmem %s26_s12, 128  ;;  %p187_p6 = scmp.lt.s32.totalorder %s26_s12, %s26_s12 }
   0xd   :  { %p183_p5 = scmp.ne.s32.totalorder %s26_s12, %s182_s16  ;;  %p188_p7 = scmp.lt.s32.totalorder %s182_s16, %s182_s16 }
   0xf   :  { %p189_p8 = por %p188_p7, %p187_p6 }
  0x11   :  { %p190_p9 = pnand %p189_p8, %p183_p5 }
  0x13   :  { %193 = shalt.err (!%p190_p9)
}
  0x14   :  { %28 = dma.hbm_to_vmem [thread:$0]  %s244_s1, 128, %s26_s12, [#allocation10]  }
  0x15   :  { %194 = dma.done.wait [#allocation8], 128  }
  0x16   :  { %195 = vsyncadd [#allocation8], 4294967168 }
  0x17   :  { %196 = dma.done.wait [#allocation10], 128  }
  0x18   :  { %197 = vsyncadd [#allocation10], 4294967168  ;;  %vm39_vm0 = vcmask 7168   ;;  %v200_v0 = vmov -inf   ;;  %v45_v1 = vld [vmem:[#allocation7] sm:$0xff]  ;;  %vm51_vm1 = vcmask 261120  }
  0x19   :  { %40 = vst.msk [vmem:[#allocation2] sm:$0xff] %vm39_vm0, %v200_v0  ;;  %41 = vst.msk [vmem:[#allocation4] sm:$0xff] %vm39_vm0, %v200_v0  ;;  %v47_v2 = vld [vmem:[#allocation9] sm:$0xff]  ;;  %v46_v3 = vmul.f32 0.5, %v45_v1  ;;  %v201_v7 = vmov 0   ;;  %v202_v8 = vmov 0.0  }
  0x1a   :  { %v48_v4 = vmul.f32 0.5, %v47_v2  ;;  %138 = vset.pattern.permute.xlu1 %v201_v7  ;;  %139 = vset.pattern.permute.xlu0 %v201_v7  ;;  %42 = vst.msk [vmem:[#allocation3] sm:$0xff] %vm39_vm0, %v202_v8  ;;  %43 = vst.msk [vmem:[#allocation5] sm:$0xff] %vm39_vm0, %v202_v8 }
  0x1b   :  { %v52_v5 = vsel %vm51_vm1, %v46_v3, -inf  ;;  %44 = vst.msk [vmem:[#allocation6] sm:$0xff] %vm39_vm0, %v202_v8 }
  0x1c   :  { %53 = vmax.xlane.f32.xlu0 %v52_v5  ;;  %v77_v6 = vsel %vm51_vm1, %v48_v4, -inf  ;;  %v49_v25 = vsub.f32 %v48_v4, %v46_v3 }
  0x20   :  { %78 = vmax.xlane.f32.xlu0 %v77_v6  ;;  %v50_v9 = vld [vmem:[#allocation2] sm:$0xff]  ;;  %v76_v12 = vld [vmem:[#allocation4] sm:$0xff] }
  0x21   :  { %v56_v33 = vld [vmem:[#allocation3] sm:$0xff]  ;;  %v92_v37 = vld [vmem:[#allocation5] sm:$0xff] }
  0x22   :  { %v99_v39 = vld [vmem:[#allocation6] sm:$0xff] }
  0xa5   :  { %v54_v10 = vpop.xlane.xlu0 %53 }
  0xa6   :  { %v55_v11 = vmax.f32 %v50_v9, %v54_v10 }
  0xa8   :  { %v57_v13 = vsub.f32 %v50_v9, %v55_v11  ;;  %75 = vst.msk [vmem:[#allocation2] sm:$0xff] %vm39_vm0, %v55_v11  ;;  %63 = vperm.xlu1 %138, %v55_v11  }
  0xa9   :  { %v79_v14 = vpop.xlane.xlu0 %78 }
  0xaa   :  { %v80_v15 = vmax.f32 %v76_v12, %v79_v14  ;;  %v58_v30 = vmul.f32 1.442695, %v57_v13 }
  0xac   :  { %v81_v16 = vsub.f32 %v76_v12, %v80_v15  ;;  %107 = vst.msk [vmem:[#allocation4] sm:$0xff] %vm39_vm0, %v80_v15  ;;  %86 = vperm.xlu1 %138, %v80_v15  }
  0xae   :  { %v82_v31 = vmul.f32 1.442695, %v81_v16 }
  0xaf   :  { %v115_v51 = vld [vmem:[#allocation2] sm:$0xff] }
  0xb3   :  { %v121_v57 = vld [vmem:[#allocation4] sm:$0xff] }
 0x123   :  { %v64_v17 = vpop.permute.xlu1 %63 }
 0x124   :  { %v66_v18 = vsub.f32 %v46_v3, %v64_v17 }
 0x126   :  { %v67_v19 = vmul.f32 1.442695, %v66_v18 }
 0x127   :  { %v87_v20 = vpop.permute.xlu1 %86 }
 0x128   :  { %140 = vpow2.f32 %v67_v19  ;;  %v89_v21 = vsub.f32 %v48_v4, %v87_v20 }
 0x12a   :  { %v90_v22 = vmul.f32 1.442695, %v89_v21 }
 0x12c   :  { %142 = vpow2.f32 %v90_v22 }
 0x12d   :  { %144 = vpow2.f32 %v58_v30 }
 0x12e   :  { %146 = vpow2.f32 %v82_v31 }
 0x135   :  { %v141_v23 = vpop.eup %140 }
 0x136   :  { %v69_v24 = vsel %vm51_vm1, %v141_v23, 0.0 }
 0x137   :  { %70 = vadd.xlane.f32.xlu0 %v69_v24 }
 0x139   :  { %v143_v26 = vpop.eup %142 }
 0x13a   :  { %v94_v27 = vsel %vm51_vm1, %v143_v26, 0.0  ;;  %v101_v28 = vmul.f32 %v143_v26, %v49_v25  ;;  %v145_v32 = vpop.eup %144 }
 0x13b   :  { %95 = vadd.xlane.f32.xlu1 %v94_v27  ;;  %v60_v34 = vmul.f32 %v145_v32, %v56_v33  ;;  %v147_v35 = vpop.eup %146 }
 0x13c   :  { %v102_v29 = vsel %vm51_vm1, %v101_v28, 0.0  ;;  %v93_v40 = vmul.f32 %v147_v35, %v92_v37  ;;  %v100_v43 = vmul.f32 %v147_v35, %v99_v39 }
 0x13d   :  { %103 = vadd.xlane.f32.xlu0 %v102_v29 }
 0x1c0   :  { %v71_v36 = vpop.xlane.xlu0 %70 }
 0x1c1   :  { %v72_v38 = vadd.f32 %v71_v36, %v60_v34 }
 0x1c3   :  { %74 = vst.msk [vmem:[#allocation3] sm:$0xff] %vm39_vm0, %v72_v38 }
 0x1c4   :  { %v96_v41 = vpop.xlane.xlu1 %95 }
 0x1c5   :  { %v97_v42 = vadd.f32 %v96_v41, %v93_v40 }
 0x1c6   :  { %v104_v44 = vpop.xlane.xlu0 %103 }
 0x1c7   :  { %98 = vst.msk [vmem:[#allocation5] sm:$0xff] %vm39_vm0, %v97_v42  ;;  %v105_v45 = vadd.f32 %v104_v44, %v100_v43 }
 0x1c9   :  { %106 = vst.msk [vmem:[#allocation6] sm:$0xff] %vm39_vm0, %v105_v45 }
 0x1ca   :  { %v116_v46 = vld [vmem:[#allocation3] sm:$0xff] }
 0x1cb   :  { %148 = vlog2.f32 %v116_v46 }
 0x1ce   :  { %v112_v47 = vld [vmem:[#allocation5] sm:$0xff] }
 0x1cf   :  { %150 = vrcp.f32 %v112_v47 }
 0x1d0   :  { %152 = vlog2.f32 %v112_v47  ;;  %v111_v52 = vld [vmem:[#allocation6] sm:$0xff] }
 0x1d8   :  { %v149_v48 = vpop.eup %148 }
 0x1d9   :  { %v118_v49 = vmul.f32 0.6931472, %v149_v48 }
 0x1db   :  { %v119_v55 = vadd.f32 %v118_v49, %v115_v51 }
 0x1dc   :  { %v151_v50 = vpop.eup %150 }
 0x1dd   :  { %v153_v53 = vpop.eup %152  ;;  %v114_v54 = vmul.f32 %v151_v50, %v111_v52 }
 0x1de   :  { %v123_v56 = vmul.f32 0.6931472, %v153_v53 }
 0x1df   :  { %v120_v58 = vadd.f32 %v119_v55, %v114_v54 }
 0x1e0   :  { %v124_v59 = vadd.f32 %v123_v56, %v121_v57 }
 0x1e2   :  { %v125_v60 = vsub.f32 %v120_v58, %v124_v59 }
 0x1e4   :  { %126 = vst.msk [vmem:[%s245_s2] sm:$0xff] %vm39_vm0, %v125_v60 }
 0x1e5   :  { %131 = vsyncpa [#allocation8], 1 }
 0x1e6   :  { %132 = vsyncpa [#allocation10], 1 }

</bundles_post_ra>
